<compile_context>
chip_gen: v5e
topology: v5e:2x2
jax: 0.10.0
libtpu: 0.0.40
codegen_flags: <defaults>
</compile_context>

<pallas_src>
import jax
import jax.numpy as jnp
from jax.experimental import pallas as pl
from jax.experimental.pallas import tpu as pltpu


def classifier_kernel(logits_ref, labels_ref, loss_ref, pred_ref):
    """One batch tile.

    logits_ref: (TB, C) f32      labels_ref: (1, TB) i32  (lane-dense row)
    loss_ref:   (1, TB) f32      per-example cross-entropy (lane-dense row)
    pred_ref:   (1, TB) i32      argmax class per example  (lane-dense row)
    """
    logits = logits_ref[...]
    TB, C = logits.shape

    # ---- numerically-stable log-sum-exp over classes (lane reduction) ----
    row_max = jnp.max(logits, axis=1, keepdims=True)               # XLU
    shifted = logits - row_max                                     # VPU; `logits` dead after
    sumexp = jnp.sum(jnp.exp(shifted), axis=1, keepdims=True)      # EUP + XLU

    # ---- gather shifted[b, labels[b]] via a lane-iota mask (no dyn gather) ----
    labels_col = labels_ref[...].reshape(TB, 1)                    # (1,TB) -> (TB,1) relayout
    col = jax.lax.broadcasted_iota(jnp.int32, (TB, C), 1)
    shifted_label = jnp.sum(
        jnp.where(col == labels_col, shifted, 0.0), axis=1, keepdims=True)

    # per-example CE = lse - logits[label] = log(sumexp) - shifted[label]
    per_example = jnp.log(sumexp) - shifted_label                  # (TB, 1)
    loss_ref[...] = per_example.reshape(1, TB)                     # lane-dense store

    # ---- argmax over classes (first occurrence, like torch.max(dim=1)) ----
    idx = jnp.where(shifted == 0.0, col, C)                        # reuse `shifted` as the mask
    pred_ref[...] = (
        jnp.min(idx, axis=1, keepdims=True).reshape(1, TB).astype(jnp.int32))


def _pick_batch_tile(batch, num_classes, bytes_per_elem=4, vmem_budget=24 << 20):
    """Largest legal batch tile keeping double-buffered logits under budget."""
    if 2 * batch * num_classes * bytes_per_elem <= vmem_budget:
        return batch                      # whole batch fits: single tile
    cap = (vmem_budget // (2 * num_classes * bytes_per_elem)) // 128 * 128
    cap = max(cap, 128)
    # Tile must divide B and be a multiple of 128 (lane constraint on the
    # (1, TB) label / loss / prediction blocks).
    for tb in range(cap, 0, -128):
        if batch % tb == 0:
            return tb
    return batch                          # fallback: whole batch in one tile


def classifier_forward(logits, labels):
    """logits: (B, C) float32, labels: (B,) integer class ids.

    Returns (mean cross-entropy loss: f32 scalar, predictions: (B,) int32),
    matching Classifier.forward (nn.CrossEntropyLoss + torch.max(dim=1)).
    """
    B, C = logits.shape
    logits = logits.astype(jnp.float32)
    labels_row = labels.astype(jnp.int32).reshape(1, B)   # lane-dense row (metadata reshape)

    TB = _pick_batch_tile(B, C)
    num_tiles = B // TB

    cost = pl.CostEstimate(
        flops=int(6 * B * C),                 # max / sub / cmp / select / sum passes
        transcendentals=int(B * C + B),       # exp per element + log per row
        bytes_accessed=int(B * C * 4 + B * 4 + 2 * B * 4),
    )

    per_example, preds = pl.pallas_call(
        classifier_kernel,
        out_shape=(
            jax.ShapeDtypeStruct((1, B), jnp.float32),    # per-example losses
            jax.ShapeDtypeStruct((1, B), jnp.int32),      # predictions
        ),
        grid_spec=pltpu.PrefetchScalarGridSpec(
            num_scalar_prefetch=0,
            grid=(num_tiles,),
            in_specs=[
                pl.BlockSpec((TB, C), lambda i: (i, 0)),  # logits batch tile, C whole
                pl.BlockSpec((1, TB), lambda i: (0, i)),  # labels row slice
            ],
            out_specs=(
                pl.BlockSpec((1, TB), lambda i: (0, i)),  # per-example loss row slice
                pl.BlockSpec((1, TB), lambda i: (0, i)),  # prediction row slice
            ),
        ),
        compiler_params=pltpu.CompilerParams(
            # Batch tiles are fully independent (per-example losses summed in
            # the wrapper), so the axis can be sharded across TensorCores.
            dimension_semantics=("parallel",),
            vmem_limit_bytes=32 * 1024 * 1024,
        ),
        cost_estimate=cost,
    )(logits, labels_row)

    # TODO(synk): in OpenNRE's SoftmaxNN this whole op would ideally be fused
    # into the fc matmul that produces `logits`; as a standalone module it must
    # re-read logits from HBM once.
    loss = jnp.sum(per_example) * (1.0 / B)
    return loss, preds[0]


if __name__ == "__main__":
    # Small shapes consistent with the module: batch=8, num_classes=32.
    B, C = 8, 32

    key = jax.random.PRNGKey(0)
    k_logits, k_labels = jax.random.split(key)
    logits = jax.random.normal(k_logits, (B, C), dtype=jnp.float32)
    labels = jax.random.randint(k_labels, (B,), 0, C, dtype=jnp.int32)

    loss, preds = classifier_forward(logits, labels)
    loss = jax.block_until_ready(loss)
    preds = jax.block_until_ready(preds)

    # ---- pure-JAX reference (nn.CrossEntropyLoss mean + torch.max(dim=1)) ----
    logp = jax.nn.log_softmax(logits, axis=1)
    ref_loss = -jnp.mean(logp[jnp.arange(B), labels])
    ref_pred = jnp.argmax(logits, axis=1).astype(jnp.int32)

    assert preds.shape == (B,), preds.shape
    assert jnp.allclose(loss, ref_loss, atol=1e-4, rtol=1e-4), (loss, ref_loss)
    assert jnp.array_equal(preds, ref_pred), (preds, ref_pred)
    print("KERNEL_OK")
</pallas_src>

<mosaic_0001>
module attributes {stable_mosaic.version = 11 : i64} {
  func.func @classifier_kernel(%arg0: i32, %arg1: memref<8x32xf32, #tpu.memory_space<vmem>>, %arg2: memref<1x8xi32, #tpu.memory_space<vmem>>, %arg3: memref<1x8xf32, #tpu.memory_space<vmem>>, %arg4: memref<1x8xi32, #tpu.memory_space<vmem>>) attributes {dimension_semantics = [#tpu.dimension_semantics<parallel>], iteration_bounds = array<i64: 1>, scalar_prefetch = 0 : i64, scratch_operands = 0 : i64, tpu.core_type = #tpu.core_type<tc>, window_params = [{transform_indices = @transform_0, window_bounds = array<i64: 8, 32>}, {transform_indices = @transform_1, window_bounds = array<i64: 1, 8>}, {transform_indices = @transform_2, window_bounds = array<i64: 1, 8>}, {transform_indices = @transform_3, window_bounds = array<i64: 1, 8>}]} {
    %c0 = arith.constant 0 : index
    %c0_0 = arith.constant 0 : index
    %0 = vector.load %arg1[%c0, %c0_0] : memref<8x32xf32, #tpu.memory_space<vmem>>, vector<8x32xf32>
    %cst = arith.constant dense<0xFF800000> : vector<8xf32>
    %1 = vector.multi_reduction <maximumf>, %0, %cst [1] : vector<8x32xf32> to vector<8xf32>
    %2 = vector.shape_cast %1 : vector<8xf32> to vector<8x1xf32>
    %3 = vector.broadcast %2 : vector<8x1xf32> to vector<8x32xf32>
    %4 = arith.subf %0, %3 : vector<8x32xf32>
    %5 = math.exp %4 : vector<8x32xf32>
    %cst_1 = arith.constant dense<0.000000e+00> : vector<8xf32>
    %6 = vector.multi_reduction <add>, %5, %cst_1 [1] : vector<8x32xf32> to vector<8xf32>
    %7 = vector.shape_cast %6 : vector<8xf32> to vector<8x1xf32>
    %c0_2 = arith.constant 0 : index
    %c0_3 = arith.constant 0 : index
    %8 = vector.load %arg2[%c0_2, %c0_3] : memref<1x8xi32, #tpu.memory_space<vmem>>, vector<1x8xi32>
    %9 = vector.shape_cast %8 : vector<1x8xi32> to vector<8x1xi32>
    %10 = tpu.iota {dimensions = array<i32: 1>} : vector<8x32xi32>
    %11 = vector.broadcast %9 : vector<8x1xi32> to vector<8x32xi32>
    %12 = arith.cmpi eq, %10, %11 : vector<8x32xi32>
    %cst_4 = arith.constant 0.000000e+00 : f32
    %13 = vector.broadcast %cst_4 : f32 to vector<8x32xf32>
    %14 = arith.select %12, %4, %13 : vector<8x32xi1>, vector<8x32xf32>
    %cst_5 = arith.constant dense<0.000000e+00> : vector<8xf32>
    %15 = vector.multi_reduction <add>, %14, %cst_5 [1] : vector<8x32xf32> to vector<8xf32>
    %16 = vector.shape_cast %15 : vector<8xf32> to vector<8x1xf32>
    %17 = math.log %7 : vector<8x1xf32>
    %18 = arith.subf %17, %16 : vector<8x1xf32>
    %19 = vector.shape_cast %18 : vector<8x1xf32> to vector<1x8xf32>
    %c0_6 = arith.constant 0 : index
    %c0_7 = arith.constant 0 : index
    %20 = vector.load %arg3[%c0_6, %c0_7] : memref<1x8xf32, #tpu.memory_space<vmem>>, vector<1x8xf32>
    tpu.vector_store %arg3[%c0_6, %c0_7], %19 {strides = array<i32>} : memref<1x8xf32, #tpu.memory_space<vmem>>, vector<1x8xf32>,
    %cst_8 = arith.constant 0.000000e+00 : f32
    %21 = vector.broadcast %cst_8 : f32 to vector<8x32xf32>
    %22 = arith.cmpf oeq, %4, %21 : vector<8x32xf32>
    %c32_i32 = arith.constant 32 : i32
    %23 = vector.broadcast %c32_i32 : i32 to vector<8x32xi32>
    %24 = arith.select %22, %10, %23 : vector<8x32xi1>, vector<8x32xi32>
    %cst_9 = arith.constant dense<2147483647> : vector<8xi32>
    %25 = vector.multi_reduction <minsi>, %24, %cst_9 [1] : vector<8x32xi32> to vector<8xi32>
    %26 = vector.shape_cast %25 : vector<8xi32> to vector<8x1xi32>
    %27 = vector.shape_cast %26 : vector<8x1xi32> to vector<1x8xi32>
    %c0_10 = arith.constant 0 : index
    %c0_11 = arith.constant 0 : index
    %28 = vector.load %arg4[%c0_10, %c0_11] : memref<1x8xi32, #tpu.memory_space<vmem>>, vector<1x8xi32>
    tpu.vector_store %arg4[%c0_10, %c0_11], %27 {strides = array<i32>} : memref<1x8xi32, #tpu.memory_space<vmem>>, vector<1x8xi32>,
    return
  }
  func.func @transform_0(%arg0: i32) -> (i32, i32) {
    %c0_i32 = arith.constant 0 : i32
    %c0_i32_0 = arith.constant 0 : i32
    return %arg0, %c0_i32 : i32, i32
  }
  func.func @transform_1(%arg0: i32) -> (i32, i32) {
    %c0_i32 = arith.constant 0 : i32
    %c0_i32_0 = arith.constant 0 : i32
    return %c0_i32, %arg0 : i32, i32
  }
  func.func @transform_2(%arg0: i32) -> (i32, i32) {
    %c0_i32 = arith.constant 0 : i32
    %c0_i32_0 = arith.constant 0 : i32
    return %c0_i32, %arg0 : i32, i32
  }
  func.func @transform_3(%arg0: i32) -> (i32, i32) {
    %c0_i32 = arith.constant 0 : i32
    %c0_i32_0 = arith.constant 0 : i32
    return %c0_i32, %arg0 : i32, i32
  }
}

</mosaic_0001>

<bundles_post_ra>
// kernel: tpu_custom_call.1
= control target key start
LH: loop header
LB: loop body
LE: loop exit
PB: predicated region body
PF: predicated region fallthrough
CT: control target
= control target key end

     0   :  { %9 = vsyncpa [#allocation3], 0  ;;  %s285_s0 = inlined_call_operand.hbm [shape: f32[8,32], index: 0, kind: input, shape index: {}]   ;;  %s286_s1 = inlined_call_operand.hbm [shape: s32[1,8], index: 1, kind: input, shape index: {}]   ;;  %s287_s2 = inlined_call_operand.hbm [shape: f32[1,8], index: 2, kind: output, shape index: {0}]   ;;  %s288_s3 = inlined_call_operand.hbm [shape: s32[1,8], index: 3, kind: output, shape index: {1}]  }
   0x1   :  { %10 = vsyncpa [#allocation6], 0 }
   0x2   :  { %11 = vsyncpa [#allocation4], 0 }
   0x3   :  { %12 = vsyncpa [#allocation9], 0  ;;  %s18_s14 = sshll.u32 %s285_s0, 4  ;;  %s245_s15 = smov [#allocation2]   ;;  %s19_s14 = int_to_ptr.hbm [resolvable:$true] %s18_s14 }
   0x4   :  { %s20_s16 = sshll.u32 %s245_s15, 4  ;;  %s29_s19 = sshll.u32 %s286_s1, 4  ;;  %s21_s16 = int_to_ptr.vmem [resolvable:$true] %s20_s16  ;;  %s30_s19 = int_to_ptr.hbm [resolvable:$true] %s29_s19 }
   0x5   :  { %23 = dma.hbm_to_vmem [thread:$0]  %s19_s14, 128, %s21_s16, [#allocation3]  }
   0x6   :  { %s246_s20 = smov [#allocation5]  }
   0x7   :  { %s31_s21 = sshll.u32 %s246_s20, 4  ;;  %s32_s21 = int_to_ptr.vmem [resolvable:$true] %s31_s21 }
   0x8   :  { %34 = dma.hbm_to_vmem [thread:$0]  %s30_s19, 16, %s32_s21, [#allocation6]  }
   0x9   :  { %237 = dma.done.wait [#allocation3], 128  }
   0xa   :  { %238 = vsyncadd [#allocation3], 4294967168 }
   0xb   :  { %239 = dma.done.wait [#allocation6], 16  }
   0xc   :  { %240 = vsyncadd [#allocation6], 4294967280  ;;  %v56_v0 = vlaneseq  ;;  %vm44_vm0 = vcmask 261120   ;;  %v43_v2 = vld [vmem:[#allocation2] sm:$0xff]  ;;  %v136_v4 = vld [vmem:[#allocation5] ss:$0 sm:$0xff] }
   0xd   :  { %v45_v3 = vsel %vm44_vm0, %v43_v2, -inf  ;;  %s247_s0 = smov [#allocation8]   ;;  %s114_s24 = sshll.u32 %s288_s3, 4  ;;  %vm75_vm4 = vcmask 57344   ;;  %s115_s24 = int_to_ptr.hbm [resolvable:$true] %s114_s24 }
   0xe   :  { %v57_v1 = vshrl.u32 %v56_v0, 7  ;;  %46 = vmax.xlane.f32.xlu0 %v45_v3  ;;  %v63_v5 = vand.u32 127, %v56_v0  ;;  %s112_s1 = sshll.u32 %s247_s0, 4  ;;  %s248_s25 = smov [#allocation7]   ;;  %s113_s1 = int_to_ptr.vmem [resolvable:$true] %s112_s1 }
   0xf   :  { %s101_s26 = sshll.u32 %s248_s25, 4  ;;  %s103_s29 = sshll.u32 %s287_s2, 4  ;;  %s102_s26 = int_to_ptr.vmem [resolvable:$true] %s101_s26  ;;  %s104_s29 = int_to_ptr.hbm [resolvable:$true] %s103_s29 }
  0x10   :  { %134 = vset.pattern.permute.xlu1 %v57_v1  ;;  %135 = vset.pattern.permute.xlu0 %v57_v1 }
  0x18   :  { %60 = vperm.xlu1 %134, %v136_v4  }
  0x81   :  { %v47_v6 = vpop.xlane.xlu0 %46 }
  0x82   :  { %v48_v7 = vsub.f32 %v43_v2, %v47_v6 }
  0x84   :  { %v49_v8 = vmul.f32 1.442695, %v48_v7  ;;  %vm77_vm1 = vcmp.eq.f32.partialorder %v48_v7, 0.0 }
  0x85   :  { %v78_v9 = vsel %vm77_vm1, %v63_v5, 32 }
  0x86   :  { %137 = vpow2.f32 %v49_v8  ;;  %v79_v10 = vsel %vm44_vm0, %v78_v9, 2147483647 }
  0x87   :  { %v81_v11 = vshra.s32 %v79_v10, 16  ;;  %v80_v15 = vand.u32 65535, %v79_v10 }
  0x89   :  { %v83_v12 = vcvt.s32.f32 %v81_v11  ;;  %v82_v17 = vcvt.s32.f32 %v80_v15 }
  0x8a   :  { %v61_v18 = vpop.permute.xlu1 %60 }
  0x8b   :  { %84 = vmin.xlane.f32.xlu0 %v83_v12  ;;  %vm64_vm3 = vcmp.eq.s32.totalorder %v63_v5, %v61_v18 }
  0x8c   :  { %v138_v13 = vpop.eup %137  ;;  %v65_v20 = vsel %vm64_vm3, %v48_v7, 0.0 }
  0x8d   :  { %v51_v14 = vsel %vm44_vm0, %v138_v13, 0.0  ;;  %v66_v21 = vsel %vm44_vm0, %v65_v20, 0.0 }
  0x8e   :  { %52 = vadd.xlane.f32.xlu1 %v51_v14 }
  0xfe   :  { %v85_v16 = vpop.xlane.xlu0 %84 }
  0xff   :  { %vm86_vm2 = vcmp.eq.f32.partialorder %v83_v12, %v85_v16  ;;  %v91_v23 = vcvt.f32.s32 %v85_v16 }
 0x100   :  { %v87_v19 = vsel %vm86_vm2, %v82_v17, inf }
 0x101   :  { %88 = vmin.xlane.f32.xlu2 %v87_v19  ;;  %v53_v22 = vpop.xlane.xlu1 %52  ;;  %v92_v25 = vshll.u32 %v91_v23, 16 }
 0x102   :  { %139 = vlog2.f32 %v53_v22 }
 0x108   :  { %v140_v28 = vpop.eup %139 }
 0x109   :  { %67 = vadd.xlane.f32.xlu2 %v66_v21  ;;  %v70_v30 = vmul.f32 0.6931472, %v140_v28 }
 0x174   :  { %v89_v24 = vpop.xlane.xlu2 %88 }
 0x175   :  { %v90_v26 = vcvt.f32.s32 %v89_v24 }
 0x177   :  { %v93_v27 = vadd.s32 %v92_v25, %v90_v26 }
 0x179   :  { %v94_v29 = vperm.slane %v93_v27, %v63_v5 }
 0x17b   :  { %95 = vst.msk [vmem:[#allocation8] sm:$0x1] %vm75_vm4, %v94_v29 }
 0x17c   :  { %v68_v31 = vpop.xlane.xlu2 %67  ;;  %117 = dma.vmem_to_hbm [thread:$0]  %s113_s1, 16, %s115_s24, [#allocation9]  }
 0x17d   :  { %v71_v32 = vsub.f32 %v70_v30, %v68_v31 }
 0x17f   :  { %v73_v33 = vperm.slane %v71_v32, %v63_v5 }
 0x181   :  { %76 = vst.msk [vmem:[#allocation7] sm:$0x1] %vm75_vm4, %v73_v33 }
 0x182   :  { %106 = dma.vmem_to_hbm [thread:$0]  %s102_s26, 16, %s104_s29, [#allocation4]  }
 0x183   :  { %241 = dma.done.wait [#allocation4], 16  }
 0x184   :  { %242 = vsyncadd [#allocation4], 4294967280 }
 0x185   :  { %243 = dma.done.wait [#allocation9], 16  }
 0x186   :  { %244 = vsyncadd [#allocation9], 4294967280 }
 0x187   :  { %126 = vsyncpa [#allocation3], 1 }
 0x188   :  { %127 = vsyncpa [#allocation6], 1 }
 0x189   :  { %128 = vsyncpa [#allocation4], 1 }
 0x18a   :  { %129 = vsyncpa [#allocation9], 1 }

</bundles_post_ra>
